<compile_context>
chip_gen: v5e
topology: v5e:2x2
jax: 0.10.0
libtpu: 0.0.40
codegen_flags: <defaults>
</compile_context>

<pallas_src>
import jax
import jax.numpy as jnp
from jax.experimental import pallas as pl
from jax.experimental.pallas import tpu as pltpu

_LANES = 128


def _round_up(x, m):
    return ((x + m - 1) // m) * m


def _pick_tile_n(n, c):
    # ~2 MiB of f32 working set per logits block; with double buffering plus
    # the in-kernel f32 copy this stays far below the 32 MiB scoped limit.
    budget_rows = max(8, (2 * 1024 * 1024) // max(1, c * 4))
    tile = max(8, min(1024, (budget_rows // 8) * 8))
    return min(tile, _round_up(n, 8))


def _spl_loss_kernel(x_ref, tgt_ref, scal_ref, v_ref, psum_ref):
    # x_ref:    (TILE_N, C)   logits block, native dtype (f32 / bf16)
    # tgt_ref:  (TILE_N, 1)   int32 labels, -1 == ignore_index
    # scal_ref: (2,)          f32 SMEM scalars: [threshold, 1/N]
    # v_ref:    (TILE_N, 1)   int32 selection-mask output
    # psum_ref: (1, 1, 128)   f32 per-tile partial mean (lane-dense block)
    x = x_ref[...].astype(jnp.float32)      # in-kernel upcast; HBM carries native dtype
    t = tgt_ref[...]                        # (TILE_N, 1)
    thr = scal_ref[0]
    inv_n = scal_ref[1]

    tn, c = x.shape

    # Numerically stable log-sum-exp per row (exp on EUP, reductions on XLU).
    row_max = jnp.max(x, axis=-1, keepdims=True)                      # (TILE_N, 1)
    shifted = x - row_max                                             # (TILE_N, C)
    lse = jnp.log(jnp.sum(jnp.exp(shifted), axis=-1, keepdims=True))  # (TILE_N, 1)

    # Gather the target logit via iota one-hot + lane reduce (no gather op).
    col = jax.lax.broadcasted_iota(jnp.int32, (tn, c), 1)             # (TILE_N, C)
    x_tgt = jnp.sum(jnp.where(col == t, shifted, 0.0),
                    axis=-1, keepdims=True)                           # (TILE_N, 1)

    # Per-sample cross entropy; ignored rows (target == -1, incl. padding) give
    # 0, matching CrossEntropyLoss(ignore_index=-1, reduction='none').
    super_loss = jnp.where(t == -1, 0.0, lse - x_tgt)                 # (TILE_N, 1)

    # Self-paced selection mask.
    selected = super_loss < thr
    v_ref[...] = selected.astype(jnp.int32)

    # Per-tile contribution to the global mean, broadcast across 128 lanes so
    # the store is a full unmasked vst.  Final tiny reduction in the wrapper.
    weighted = jnp.where(selected, super_loss, 0.0)
    part = jnp.sum(weighted) * inv_n
    psum_ref[...] = jnp.full(psum_ref.shape, part, dtype=jnp.float32)


def spl_loss_forward(logits, target, index, v_state, threshold, *, tile_n=None):
    """JAX/Pallas equivalent of SPLLoss.forward. Returns (mean_loss, new_v_state)."""
    n, c = logits.shape
    if tile_n is None:
        tile_n = _pick_tile_n(n, c)
    assert tile_n % 8 == 0
    n_pad = _round_up(n, tile_n)
    g = n_pad // tile_n

    x = logits                                   # keep native dtype (no wrapper upcast)
    t = target.astype(jnp.int32)
    if n_pad != n:
        # Padded rows carry target == -1 -> super_loss == 0 -> zero contribution.
        x = jnp.pad(x, ((0, n_pad - n), (0, 0)))
        t = jnp.pad(t, (0, n_pad - n), constant_values=-1)
    t2d = t.reshape(n_pad, 1)
    scal = jnp.array([threshold, 1.0 / n], dtype=jnp.float32)

    grid_spec = pltpu.PrefetchScalarGridSpec(
        num_scalar_prefetch=0,
        grid=(g,),
        in_specs=[
            pl.BlockSpec((tile_n, c), lambda i: (i, 0)),          # logits (native dtype)
            pl.BlockSpec((tile_n, 1), lambda i: (i, 0)),          # targets
            pl.BlockSpec(memory_space=pltpu.MemorySpace.SMEM),    # [threshold, 1/N]
        ],
        out_specs=(
            pl.BlockSpec((tile_n, 1), lambda i: (i, 0)),          # v mask
            pl.BlockSpec((1, 1, _LANES), lambda i: (i, 0, 0)),    # partial means
        ),
    )

    v2d, psums = pl.pallas_call(
        _spl_loss_kernel,
        grid_spec=grid_spec,
        out_shape=(
            jax.ShapeDtypeStruct((n_pad, 1), jnp.int32),
            jax.ShapeDtypeStruct((g, 1, _LANES), jnp.float32),
        ),
        compiler_params=pltpu.CompilerParams(
            dimension_semantics=("parallel",),     # no reduction axis -> megacore-friendly
            vmem_limit_bytes=32 * 1024 * 1024,     # explicit; fits v7x 64 MiB VMEM
        ),
    )(x, t2d, scal)

    loss = jnp.sum(psums[:, 0, 0])                 # tiny reduce over num_tiles
    v = v2d[:n, 0]
    # TODO(synk): the `self.v[index] = v` scatter could be fused in-kernel via a
    # scalar-prefetched `index` + input_output_aliases; kept as functional JAX glue.
    new_v_state = v_state.at[index].set(v)
    return loss, new_v_state


def _reference(logits, target, threshold):
    """Pure-JAX reference matching PyTorch CE(ignore_index=-1, 'none')."""
    x = logits.astype(jnp.float32)
    lse = jax.nn.logsumexp(x, axis=-1)
    safe_t = jnp.clip(target, 0, x.shape[-1] - 1)
    x_t = jnp.take_along_axis(x, safe_t[:, None], axis=-1)[:, 0]
    sl = jnp.where(target == -1, 0.0, lse - x_t)
    v = (sl < threshold).astype(jnp.int32)
    return jnp.mean(sl * v), v


if __name__ == "__main__":
    key = jax.random.PRNGKey(0)
    k1, k2, k3, k4, k5, k6 = jax.random.split(key, 6)
    threshold = 0.8                                       # == self.threshold

    # Case 1: single-tile path.  N=8 samples, C=32 classes, module state n_samples=16.
    N, C, N_SAMPLES = 8, 32, 16
    logits = jax.random.normal(k1, (N, C), dtype=jnp.float32)
    target = jax.random.randint(k2, (N,), 0, C, dtype=jnp.int32).at[3].set(-1)
    index = jax.random.permutation(k3, N_SAMPLES)[:N]     # dataset indices
    v_state = jnp.zeros((N_SAMPLES,), dtype=jnp.int32)    # == self.v

    loss, new_v_state = spl_loss_forward(logits, target, index, v_state, threshold)
    loss = jax.block_until_ready(loss)
    new_v_state = jax.block_until_ready(new_v_state)

    ref_loss, ref_v = _reference(logits, target, threshold)
    ref_v_state = v_state.at[index].set(ref_v)
    assert jnp.allclose(loss, ref_loss, atol=1e-5, rtol=1e-5), (loss, ref_loss)
    assert jnp.array_equal(new_v_state, ref_v_state)

    # Case 2: exercise the multi-tile grid + row padding (N=19, C=40, TILE_N=8 -> grid=(3,)).
    N2, C2, N_SAMPLES2 = 19, 40, 32
    logits2 = jax.random.normal(k4, (N2, C2), dtype=jnp.float32)
    target2 = jax.random.randint(k5, (N2,), 0, C2, dtype=jnp.int32)
    target2 = target2.at[0].set(-1).at[11].set(-1)
    index2 = jax.random.permutation(k6, N_SAMPLES2)[:N2]
    v_state2 = jnp.zeros((N_SAMPLES2,), dtype=jnp.int32)

    loss2, new_v_state2 = spl_loss_forward(logits2, target2, index2, v_state2,
                                           threshold, tile_n=8)
    loss2 = jax.block_until_ready(loss2)
    new_v_state2 = jax.block_until_ready(new_v_state2)

    ref_loss2, ref_v2 = _reference(logits2, target2, threshold)
    ref_v_state2 = v_state2.at[index2].set(ref_v2)
    assert jnp.allclose(loss2, ref_loss2, atol=1e-5, rtol=1e-5), (loss2, ref_loss2)
    assert jnp.array_equal(new_v_state2, ref_v_state2)

    print("KERNEL_OK")
</pallas_src>

<mosaic_0001>
module attributes {stable_mosaic.version = 11 : i64} {
  func.func @_spl_loss_kernel(%arg0: i32, %arg1: memref<8x32xf32, #tpu.memory_space<vmem>>, %arg2: memref<8x1xi32, #tpu.memory_space<vmem>>, %arg3: memref<2xf32, #tpu.memory_space<smem>>, %arg4: memref<8x1xi32, #tpu.memory_space<vmem>>, %arg5: memref<1x1x128xf32, #tpu.memory_space<vmem>>) attributes {dimension_semantics = [#tpu.dimension_semantics<parallel>], iteration_bounds = array<i64: 1>, scalar_prefetch = 0 : i64, scratch_operands = 0 : i64, tpu.core_type = #tpu.core_type<tc>, window_params = [{transform_indices = @transform_0, window_bounds = array<i64: 8, 32>}, {transform_indices = @transform_1, window_bounds = array<i64: 8, 1>}, {transform_indices = @transform_2, window_bounds = array<i64: 2>}, {transform_indices = @transform_3, window_bounds = array<i64: 8, 1>}, {transform_indices = @transform_4, window_bounds = array<i64: 1, 1, 128>}]} {
    %c0 = arith.constant 0 : index
    %c0_0 = arith.constant 0 : index
    %0 = vector.load %arg1[%c0, %c0_0] : memref<8x32xf32, #tpu.memory_space<vmem>>, vector<8x32xf32>
    %c0_1 = arith.constant 0 : index
    %c0_2 = arith.constant 0 : index
    %1 = vector.load %arg2[%c0_1, %c0_2] : memref<8x1xi32, #tpu.memory_space<vmem>>, vector<8x1xi32>
    %c0_3 = arith.constant 0 : index
    %2 = memref.load %arg3[%c0_3] : memref<2xf32, #tpu.memory_space<smem>>
    %c1 = arith.constant 1 : index
    %3 = memref.load %arg3[%c1] : memref<2xf32, #tpu.memory_space<smem>>
    %cst = arith.constant dense<0xFF800000> : vector<8xf32>
    %4 = vector.multi_reduction <maximumf>, %0, %cst [1] : vector<8x32xf32> to vector<8xf32>
    %5 = vector.shape_cast %4 : vector<8xf32> to vector<8x1xf32>
    %6 = vector.broadcast %5 : vector<8x1xf32> to vector<8x32xf32>
    %7 = arith.subf %0, %6 : vector<8x32xf32>
    %8 = math.exp %7 : vector<8x32xf32>
    %cst_4 = arith.constant dense<0.000000e+00> : vector<8xf32>
    %9 = vector.multi_reduction <add>, %8, %cst_4 [1] : vector<8x32xf32> to vector<8xf32>
    %10 = vector.shape_cast %9 : vector<8xf32> to vector<8x1xf32>
    %11 = math.log %10 : vector<8x1xf32>
    %12 = tpu.iota {dimensions = array<i32: 1>} : vector<8x32xi32>
    %13 = vector.broadcast %1 : vector<8x1xi32> to vector<8x32xi32>
    %14 = arith.cmpi eq, %12, %13 : vector<8x32xi32>
    %cst_5 = arith.constant 0.000000e+00 : f32
    %15 = vector.broadcast %cst_5 : f32 to vector<8x32xf32>
    %16 = arith.select %14, %7, %15 : vector<8x32xi1>, vector<8x32xf32>
    %cst_6 = arith.constant dense<0.000000e+00> : vector<8xf32>
    %17 = vector.multi_reduction <add>, %16, %cst_6 [1] : vector<8x32xf32> to vector<8xf32>
    %18 = vector.shape_cast %17 : vector<8xf32> to vector<8x1xf32>
    %c-1_i32 = arith.constant -1 : i32
    %19 = vector.broadcast %c-1_i32 : i32 to vector<8x1xi32>
    %20 = arith.cmpi eq, %1, %19 : vector<8x1xi32>
    %21 = arith.subf %11, %18 : vector<8x1xf32>
    %cst_7 = arith.constant 0.000000e+00 : f32
    %22 = vector.broadcast %cst_7 : f32 to vector<8x1xf32>
    %23 = arith.select %20, %22, %21 : vector<8x1xi1>, vector<8x1xf32>
    %24 = vector.broadcast %2 : f32 to vector<8x1xf32>
    %25 = arith.cmpf olt, %23, %24 : vector<8x1xf32>
    %26 = arith.extui %25 : vector<8x1xi1> to vector<8x1xi32>
    %c0_8 = arith.constant 0 : index
    %c0_9 = arith.constant 0 : index
    %27 = vector.load %arg4[%c0_8, %c0_9] : memref<8x1xi32, #tpu.memory_space<vmem>>, vector<8x1xi32>
    tpu.vector_store %arg4[%c0_8, %c0_9], %26 {strides = array<i32>} : memref<8x1xi32, #tpu.memory_space<vmem>>, vector<8x1xi32>,
    %cst_10 = arith.constant 0.000000e+00 : f32
    %28 = vector.broadcast %cst_10 : f32 to vector<8x1xf32>
    %29 = arith.select %25, %23, %28 : vector<8x1xi1>, vector<8x1xf32>
    %30 = vector.shape_cast %29 : vector<8x1xf32> to vector<1x8x1xf32>
    %cst_11 = arith.constant dense<0.000000e+00> : vector<1xf32>
    %31 = vector.multi_reduction <add>, %30, %cst_11 [1, 2] : vector<1x8x1xf32> to vector<1xf32>
    %32 = vector.shape_cast %31 : vector<1xf32> to vector<1x1x1xf32>
    %33 = vector.extract %32[0, 0, 0] : f32 from vector<1x1x1xf32>
    %34 = arith.mulf %33, %3 : f32
    %35 = vector.broadcast %34 : f32 to vector<1x1x128xf32>
    %c0_12 = arith.constant 0 : index
    %c0_13 = arith.constant 0 : index
    %c0_14 = arith.constant 0 : index
    %36 = vector.load %arg5[%c0_12, %c0_13, %c0_14] : memref<1x1x128xf32, #tpu.memory_space<vmem>>, vector<1x1x128xf32>
    tpu.vector_store %arg5[%c0_12, %c0_13, %c0_14], %35 {strides = array<i32>} : memref<1x1x128xf32, #tpu.memory_space<vmem>>, vector<1x1x128xf32>,
    return
  }
  func.func @transform_0(%arg0: i32) -> (i32, i32) {
    %c0_i32 = arith.constant 0 : i32
    %c0_i32_0 = arith.constant 0 : i32
    return %arg0, %c0_i32 : i32, i32
  }
  func.func @transform_1(%arg0: i32) -> (i32, i32) {
    %c0_i32 = arith.constant 0 : i32
    %c0_i32_0 = arith.constant 0 : i32
    return %arg0, %c0_i32 : i32, i32
  }
  func.func @transform_2(%arg0: i32) -> i32 {
    %c0_i32 = arith.constant 0 : i32
    %c0_i32_0 = arith.constant 0 : i32
    return %c0_i32 : i32
  }
  func.func @transform_3(%arg0: i32) -> (i32, i32) {
    %c0_i32 = arith.constant 0 : i32
    %c0_i32_0 = arith.constant 0 : i32
    return %arg0, %c0_i32 : i32, i32
  }
  func.func @transform_4(%arg0: i32) -> (i32, i32, i32) {
    %c0_i32 = arith.constant 0 : i32
    %c0_i32_0 = arith.constant 0 : i32
    %c0_i32_1 = arith.constant 0 : i32
    return %arg0, %c0_i32, %c0_i32_0 : i32, i32, i32
  }
}

</mosaic_0001>

<bundles_post_ra>
// kernel: tpu_custom_call.1
= control target key start
LH: loop header
LB: loop body
LE: loop exit
PB: predicated region body
PF: predicated region fallthrough
CT: control target
= control target key end

     0   :  { %10 = vsyncpa [#allocation4], 0  ;;  %s196_s0 = inlined_call_operand.vmem [shape: f32[8,32], index: 0, kind: input, shape index: {}]   ;;  %s197_s1 = inlined_call_operand.vmem [shape: s32[8,1], index: 1, kind: input, shape index: {}]   ;;  %s198_s2 = inlined_call_operand.vmem [shape: f32[2], index: 2, kind: input, shape index: {}]   ;;  %s199_s3 = inlined_call_operand.vmem [shape: s32[8,1], index: 3, kind: output, shape index: {0}]   ;;  %s200_s4 = inlined_call_operand.hbm [shape: f32[1,1,128], index: 4, kind: output, shape index: {1}]  }
   0x1   :  { %11 = vsyncpa [#allocation3], 0  ;;  %s21_s17 = sshll.u32 %s198_s2, 4  ;;  %s150_s18 = smov [#allocation2]   ;;  %s22_s17 = int_to_ptr.vmem [resolvable:$true] %s21_s17 }
   0x2   :  { %24 = dma.vmem_to_smem %s22_s17, 16, %s150_s18, [#allocation4]  }
   0x3   :  { %146 = dma.done.wait [#allocation4], 16  }
   0x4   :  { %147 = vsyncadd [#allocation4], 4294967280 }
   0x5   :  { %29 = sfence }
   0x6   :  { %v30_v0 = vld [vmem:[%s196_s0] sm:$0xff]  ;;  %vm34_vm0 = vcmask 261120   ;;  %v151_v2 = vmov 0   ;;  %v46_v9 = vlaneseq  ;;  %s32_s0 = sld [smem:[#allocation2]]  ;;  %vm62_vm3 = vcmask 7168   ;;  %s152_s24 = smov [#allocation5]  }
   0x7   :  { %v35_v1 = vsel %vm34_vm0, %v30_v0, -inf  ;;  %105 = vset.pattern.permute.xlu0 %v151_v2  ;;  %v31_v3 = vld [vmem:[%s197_s1] sm:$0xff]  ;;  %s99_s23 = sld [smem:[#allocation2 + $0x1]]  ;;  %s85_s25 = sshll.u32 %s152_s24, 4  ;;  %s86_s25 = int_to_ptr.vmem [resolvable:$true] %s85_s25 }
   0x8   :  { %36 = vmax.xlane.f32.xlu0 %v35_v1  ;;  %v47_v10 = vand.u32 127, %v46_v9  ;;  %vm56_vm2 = vcmp.eq.s32.totalorder %v31_v3, 4294967295  ;;  %s87_s28 = sshll.u32 %s200_s4, 4  ;;  %s88_s28 = int_to_ptr.hbm [resolvable:$true] %s87_s28 }
   0xc   :  { %v59_v19 = vstv %s32_s0 }
  0x1c   :  { %49 = vperm.xlu0 %105, %v31_v3  }
  0x7b   :  { %v37_v4 = vpop.xlane.xlu0 %36 }
  0x7c   :  { %v38_v5 = vsub.f32 %v30_v0, %v37_v4 }
  0x7e   :  { %v39_v6 = vmul.f32 1.442695, %v38_v5 }
  0x80   :  { %106 = vpow2.f32 %v39_v6 }
  0x86   :  { %v107_v7 = vpop.eup %106 }
  0x87   :  { %v41_v8 = vsel %vm34_vm0, %v107_v7, 0.0 }
  0x88   :  { %42 = vadd.xlane.f32.xlu1 %v41_v8 }
  0x8e   :  { %v50_v11 = vpop.permute.xlu0 %49 }
  0x8f   :  { %vm51_vm1 = vcmp.eq.s32.totalorder %v47_v10, %v50_v11 }
  0x90   :  { %v52_v12 = vsel %vm51_vm1, %v38_v5, 0.0 }
  0x91   :  { %v53_v13 = vsel %vm34_vm0, %v52_v12, 0.0 }
  0x92   :  { %54 = vadd.xlane.f32.xlu1 %v53_v13 }
  0xfb   :  { %v43_v14 = vpop.xlane.xlu1 %42 }
  0xfc   :  { %108 = vlog2.f32 %v43_v14 }
 0x102   :  { %v109_v15 = vpop.eup %108 }
 0x103   :  { %v45_v16 = vmul.f32 0.6931472, %v109_v15 }
 0x105   :  { %v55_v17 = vpop.xlane.xlu1 %54 }
 0x106   :  { %v57_v18 = vsub.f32 %v45_v16, %v55_v17 }
 0x108   :  { %v58_v20 = vsel %vm56_vm2, 0.0, %v57_v18 }
 0x109   :  { %vm60_vm4 = vcmp.lt.f32.partialorder %v58_v20, %v59_v19 }
 0x10a   :  { %v64_v21 = vsel %vm60_vm4, %v58_v20, 0.0  ;;  %v61_v22 = vsel %vm60_vm4, 1, %v151_v2 }
 0x10b   :  { %v65_v23 = vsel %vm62_vm3, %v64_v21, 0.0  ;;  %63 = vst.msk [vmem:[%s199_s3] sm:$0xff] %vm62_vm3, %v61_v22 }
 0x10c   :  { %66 = vadd.xlane.f32.xlu2 %v65_v23 }
 0x17f   :  { %v67_v24 = vpop.xlane.xlu2 %66 }
 0x180   :  { %v68_v25 = vrot.slane %v67_v24, 4 }
 0x182   :  { %v69_v26 = vadd.f32 %v68_v25, %v67_v24 }
 0x184   :  { %v70_v27 = vrot.slane %v69_v26, 2 }
 0x186   :  { %v71_v28 = vadd.f32 %v70_v27, %v69_v26 }
 0x188   :  { %v72_v29 = vrot.slane %v71_v28, 1 }
 0x18a   :  { %v73_v30 = vadd.f32 %v72_v29, %v71_v28 }
 0x18c   :  { %100 = vpush %v73_v30 }
 0x1bd   :  { %s101_s29 = spop %100 }
 0x1be   :  { %s75_s30 = smul.f32 %s101_s29, %s99_s23 }
 0x1c0   :  { %v76_v31 = vstv %s75_s30 }
 0x1c1   :  { %77 = vst [vmem:[#allocation5] sm:$0x1] %v76_v31 }
 0x1c2   :  { %90 = dma.vmem_to_hbm [thread:$0]  %s86_s25, 16, %s88_s28, [#allocation3]  }
 0x1c3   :  { %148 = dma.done.wait [#allocation3], 16  }
 0x1c4   :  { %149 = vsyncadd [#allocation3], 4294967280 }
 0x1c5   :  { %97 = vsyncpa [#allocation3], 1 }
 0x1c6   :  { %98 = vsyncpa [#allocation4], 1 }

</bundles_post_ra>
